<compile_context>
chip_gen: v5e
topology: v5e:2x2
jax: 0.10.0
libtpu: 0.0.40
codegen_flags: <defaults>
</compile_context>

<pallas_src>
import functools
import math

import jax
import jax.numpy as jnp
import numpy as np
from jax.experimental import pallas as pl
from jax.experimental.pallas import tpu as pltpu

# ---- model hyperparameters (small instance of the PyTorch defaults) ----
DIM_X = 1
DIM_Y = 1
DIM_HID = 32
DIM_LAT = 32
ENC_PRE_DEPTH = 4
ENC_POST_DEPTH = 2
DEC_DEPTH = 3

_HALF_LOG_2PI = 0.5 * math.log(2.0 * math.pi)

_VMEM = pl.BlockSpec(memory_space=pltpu.MemorySpace.VMEM)

_WEIGHT_ORDER = ('ew_in', 'eb_in', 'ew_hid', 'eb_hid', 'ew_out', 'eb_out',
                 'dw_th', 'dw_z', 'dw_x', 'db0', 'dw1', 'db1', 'dwo', 'dbo')


# ---------------------------------------------------------------------------
# in-kernel helpers (shared by the eval and train kernels)
# ---------------------------------------------------------------------------
def _encoder_pre(xy_flat, ew_in_ref, eb_in_ref, ew_hid_ref, eb_hid_ref):
    """Joint (denc|lenc) pre-MLP on flat rows.  xy_flat: [R, dx+dy] -> [R, 64]."""
    h = jnp.dot(xy_flat, ew_in_ref[...],
                preferred_element_type=jnp.float32) + eb_in_ref[...]
    h = jnp.maximum(h, 0.0)
    for i in range(ENC_PRE_DEPTH - 1):            # block-diagonal hidden layers
        h = jnp.dot(h, ew_hid_ref[i],
                    preferred_element_type=jnp.float32) + eb_hid_ref[i]
        if i < ENC_PRE_DEPTH - 2:                 # no ReLU after last pre layer
            h = jnp.maximum(h, 0.0)
    return h


def _encoder_post(pooled, ew_hid_ref, eb_hid_ref, ew_out_ref, eb_out_ref):
    """Joint post-MLP on pooled rows.  pooled: [rows, 64] -> [rows, 96]."""
    g = jnp.dot(pooled, ew_hid_ref[ENC_PRE_DEPTH - 1],
                preferred_element_type=jnp.float32) + eb_hid_ref[ENC_PRE_DEPTH - 1]
    g = jnp.maximum(g, 0.0)
    return jnp.dot(g, ew_out_ref[...],
                   preferred_element_type=jnp.float32) + eb_out_ref[...]


def _decoder_logp(theta, z, xt, yt, bcast,
                  dw_th_ref, dw_z_ref, dw_x_ref, db0_ref,
                  dw1_ref, db1_ref, dwo_ref, dbo_ref):
    """Decoder (depth 3) + diagonal-Normal log-lik summed over dim_y -> [R, 1].

    The fc layer is split: encoded contribution computed per batch element and
    broadcast to points via the constant `bcast` matrix (MXU, no reshapes).
    """
    enc_h = (jnp.dot(theta, dw_th_ref[...], preferred_element_type=jnp.float32)
             + jnp.dot(z, dw_z_ref[...], preferred_element_type=jnp.float32)
             + db0_ref[...])                                            # [B, 32]
    h = (jnp.dot(xt, dw_x_ref[...], preferred_element_type=jnp.float32)
         + jnp.dot(bcast, enc_h, preferred_element_type=jnp.float32))   # [R, 32]
    h = jnp.maximum(h, 0.0)
    h = jnp.maximum(jnp.dot(h, dw1_ref[...],
                            preferred_element_type=jnp.float32) + db1_ref[...], 0.0)
    out = jnp.dot(h, dwo_ref[...],
                  preferred_element_type=jnp.float32) + dbo_ref[...]    # [R, 2*dy]
    mu = out[:, :DIM_Y]
    sigma = 0.1 + 0.9 * jax.nn.softplus(out[:, DIM_Y:])
    inv_sigma = pl.reciprocal(sigma, approx=True)                       # EUP
    zsc = (yt - mu) * inv_sigma
    logp = -0.5 * zsc * zsc - jnp.log(sigma) - _HALF_LOG_2PI
    return jnp.sum(logp, axis=-1, keepdims=True)                        # [R, 1]


def _sum_all(x):
    """Full reduction to a [1, 1] tile (explicit lane-then-sublane stages)."""
    return jnp.sum(jnp.sum(x, axis=-1, keepdims=True), axis=-2, keepdims=True)


# ---------------------------------------------------------------------------
# fused kernels
# ---------------------------------------------------------------------------
def _np_eval_kernel(xy_ref, pool_ref, bcast_ref, wsel_ref, eps_ref,
                    ew_in_ref, eb_in_ref, ew_hid_ref, eb_hid_ref,
                    ew_out_ref, eb_out_ref,
                    dw_th_ref, dw_z_ref, dw_x_ref, db0_ref,
                    dw1_ref, db1_ref, dwo_ref, dbo_ref,
                    out_ref, *, Rc, Rf):
    # joint encoder on the context rows only
    h = _encoder_pre(xy_ref[pl.ds(0, Rc), :],
                     ew_in_ref, eb_in_ref, ew_hid_ref, eb_hid_ref)
    pooled = jnp.dot(pool_ref[...], h, preferred_element_type=jnp.float32)  # [B,64]
    enc = _encoder_post(pooled, ew_hid_ref, eb_hid_ref, ew_out_ref, eb_out_ref)
    theta = enc[:, :DIM_HID]
    pmu = enc[:, DIM_HID:DIM_HID + DIM_LAT]
    praw = enc[:, DIM_HID + DIM_LAT:]
    psig = 0.1 + 0.9 * jax.nn.sigmoid(praw)
    z = pmu + psig * eps_ref[...]                                       # pz.rsample()

    xyf = xy_ref[pl.ds(Rc, Rf), :]                                      # full-set rows
    logp = _decoder_logp(theta, z, xyf[:, :DIM_X], xyf[:, DIM_X:], bcast_ref[...],
                         dw_th_ref, dw_z_ref, dw_x_ref, db0_ref,
                         dw1_ref, db1_ref, dwo_ref, dbo_ref)            # [Rf, 1]
    # [ctx_ll, tar_ll] via masked-mean weight columns (constant wsel)
    out_ref[...] = jnp.sum(logp * wsel_ref[...], axis=0, keepdims=True)  # [1, 2]


def _np_train_kernel(xy_ref, pool_ref, bcast_ref, eps_ref,
                     ew_in_ref, eb_in_ref, ew_hid_ref, eb_hid_ref,
                     ew_out_ref, eb_out_ref,
                     dw_th_ref, dw_z_ref, dw_x_ref, db0_ref,
                     dw1_ref, db1_ref, dwo_ref, dbo_ref,
                     loss_ref, recon_ref, kld_ref, *, B, Rc, Rf, N):
    # one tall pre-MLP pass over context rows + full-set rows
    h = _encoder_pre(xy_ref[...], ew_in_ref, eb_in_ref, ew_hid_ref, eb_hid_ref)
    # pool matrix: rows 0..B-1 mean-pool the context portion, rows B..2B-1 the
    # full-set portion -> [2B, 64]
    pooled = jnp.dot(pool_ref[...], h, preferred_element_type=jnp.float32)
    enc = _encoder_post(pooled, ew_hid_ref, eb_hid_ref, ew_out_ref, eb_out_ref)

    theta = enc[:B, :DIM_HID]
    pmu = enc[:B, DIM_HID:DIM_HID + DIM_LAT]
    praw = enc[:B, DIM_HID + DIM_LAT:]
    qmu = enc[B:, DIM_HID:DIM_HID + DIM_LAT]
    qraw = enc[B:, DIM_HID + DIM_LAT:]
    psig = 0.1 + 0.9 * jax.nn.sigmoid(praw)
    qsig = 0.1 + 0.9 * jax.nn.sigmoid(qraw)
    z = qmu + qsig * eps_ref[...]                                       # qz.rsample()

    xyf = xy_ref[pl.ds(Rc, Rf), :]
    logp = _decoder_logp(theta, z, xyf[:, :DIM_X], xyf[:, DIM_X:], bcast_ref[...],
                         dw_th_ref, dw_z_ref, dw_x_ref, db0_ref,
                         dw1_ref, db1_ref, dwo_ref, dbo_ref)            # [Rf, 1]

    # KL(qz || pz) per latent dim (tiny; exact divide kept)
    kl = (jnp.log(psig) - jnp.log(qsig)
          + (qsig * qsig + (qmu - pmu) ** 2) / (2.0 * psig * psig) - 0.5)

    recon = _sum_all(logp) * (1.0 / Rf)                                 # mean over B*N
    kld = _sum_all(kl) * (1.0 / B)                                      # mean over B of sum_lat
    recon_ref[...] = recon
    kld_ref[...] = kld
    loss_ref[...] = -recon + kld * (1.0 / N)


# ---------------------------------------------------------------------------
# host-side constant matrices (built from static shapes at trace time)
# ---------------------------------------------------------------------------
def _pool_ctx_mat(B, Npts):
    return np.kron(np.eye(B, dtype=np.float32),
                   np.full((1, Npts), 1.0 / Npts, np.float32))


def _pool_train_mat(B, Nc, N):
    P = np.zeros((2 * B, B * (Nc + N)), np.float32)
    P[:B, :B * Nc] = _pool_ctx_mat(B, Nc)
    P[B:, B * Nc:] = _pool_ctx_mat(B, N)
    return P


def _bcast_mat(B, N):
    return np.kron(np.eye(B, dtype=np.float32), np.ones((N, 1), np.float32))


def _wsel_mat(B, Nc, N):
    w = np.zeros((B * N, 2), np.float32)
    pt = np.arange(B * N) % N
    w[pt < Nc, 0] = 1.0 / (B * Nc)
    w[pt >= Nc, 1] = 1.0 / (B * (N - Nc))
    return w


# ---------------------------------------------------------------------------
# wrappers (one pallas_call per forward)
# ---------------------------------------------------------------------------
def np_forward_eval(packed, xc, yc, x, y, z_key):
    """Eval branch (num_samples=None, reduce_ll=True) -> (ctx_ll, tar_ll)."""
    B, Nc, _ = xc.shape
    N = x.shape[1]
    Rc, Rf = B * Nc, B * N
    xyc = jnp.concatenate([xc, yc], axis=-1).reshape(Rc, DIM_X + DIM_Y)
    xyf = jnp.concatenate([x, y], axis=-1).reshape(Rf, DIM_X + DIM_Y)
    xy_all = jnp.concatenate([xyc, xyf], axis=0)
    eps = jax.random.normal(z_key, (B, DIM_LAT), jnp.float32)
    pool = jnp.asarray(_pool_ctx_mat(B, Nc))
    bcast = jnp.asarray(_bcast_mat(B, N))
    wsel = jnp.asarray(_wsel_mat(B, Nc, N))
    w = [packed[k] for k in _WEIGHT_ORDER]
    out = pl.pallas_call(
        functools.partial(_np_eval_kernel, Rc=Rc, Rf=Rf),
        out_shape=jax.ShapeDtypeStruct((1, 2), jnp.float32),
        in_specs=[_VMEM] * (5 + len(w)),
        out_specs=_VMEM,
    )(xy_all, pool, bcast, wsel, eps, *w)
    return out[0, 0], out[0, 1]


def np_forward_train(packed, xc, yc, x, y, z_key):
    """Training branch (num_samples=None) -> (loss, recon, kld)."""
    B, Nc, _ = xc.shape
    N = x.shape[1]
    Rc, Rf = B * Nc, B * N
    xyc = jnp.concatenate([xc, yc], axis=-1).reshape(Rc, DIM_X + DIM_Y)
    xyf = jnp.concatenate([x, y], axis=-1).reshape(Rf, DIM_X + DIM_Y)
    xy_all = jnp.concatenate([xyc, xyf], axis=0)
    eps = jax.random.normal(z_key, (B, DIM_LAT), jnp.float32)
    pool = jnp.asarray(_pool_train_mat(B, Nc, N))
    bcast = jnp.asarray(_bcast_mat(B, N))
    w = [packed[k] for k in _WEIGHT_ORDER]
    loss, recon, kld = pl.pallas_call(
        functools.partial(_np_train_kernel, B=B, Rc=Rc, Rf=Rf, N=N),
        out_shape=(jax.ShapeDtypeStruct((1, 1), jnp.float32),
                   jax.ShapeDtypeStruct((1, 1), jnp.float32),
                   jax.ShapeDtypeStruct((1, 1), jnp.float32)),
        in_specs=[_VMEM] * (4 + len(w)),
        out_specs=[_VMEM, _VMEM, _VMEM],
    )(xy_all, pool, bcast, eps, *w)
    return loss[0, 0], recon[0, 0], kld[0, 0]


# ---------------------------------------------------------------------------
# parameter init (PyTorch nn.Linear default U(+-1/sqrt(fan_in))) and packing
# ---------------------------------------------------------------------------
def _linear_params(key, din, dout):
    kw, kb = jax.random.split(key)
    bound = 1.0 / math.sqrt(din)
    w = jax.random.uniform(kw, (din, dout), jnp.float32, -bound, bound)
    b = jax.random.uniform(kb, (1, dout), jnp.float32, -bound, bound)
    return w, b


def init_np_params(key):
    keys = iter(jax.random.split(key, 64))

    def mlp(din, dhid, dout, depth):
        layers = [_linear_params(next(keys), din, dhid)]
        for _ in range(depth - 2):
            layers.append(_linear_params(next(keys), dhid, dhid))
        layers.append(_linear_params(next(keys), dhid, dout))
        return layers

    denc = (mlp(DIM_X + DIM_Y, DIM_HID, DIM_HID, ENC_PRE_DEPTH)
            + mlp(DIM_HID, DIM_HID, DIM_HID, ENC_POST_DEPTH))
    lenc = (mlp(DIM_X + DIM_Y, DIM_HID, DIM_HID, ENC_PRE_DEPTH)
            + mlp(DIM_HID, DIM_HID, 2 * DIM_LAT, ENC_POST_DEPTH))
    # decoder fc rows ordered [encoded (DIM_HID + DIM_LAT) ; x (DIM_X)]
    dec = [_linear_params(next(keys), DIM_HID + DIM_LAT + DIM_X, DIM_HID)]
    for _ in range(DEC_DEPTH - 2):
        dec.append(_linear_params(next(keys), DIM_HID, DIM_HID))
    dec.append(_linear_params(next(keys), DIM_HID, 2 * DIM_Y))
    return dict(denc=denc, lenc=lenc, dec=dec)


def _block_diag(a, b):
    ra, ca = a.shape
    rb, cb = b.shape
    out = jnp.zeros((ra + rb, ca + cb), a.dtype)
    out = out.at[:ra, :ca].set(a)
    out = out.at[ra:, ca:].set(b)
    return out


def pack_np_params(params):
    """Pack raw per-layer (w, b) params into the fused-kernel operand layout."""
    denc, lenc, dec = params['denc'], params['lenc'], params['dec']
    d_pre, d_post = denc[:ENC_PRE_DEPTH], denc[ENC_PRE_DEPTH:]
    l_pre, l_post = lenc[:ENC_PRE_DEPTH], lenc[ENC_PRE_DEPTH:]

    ew_in = jnp.concatenate([d_pre[0][0], l_pre[0][0]], axis=1)          # [2, 64]
    eb_in = jnp.concatenate([d_pre[0][1], l_pre[0][1]], axis=1)          # [1, 64]

    hid_pairs = list(zip(d_pre[1:], l_pre[1:])) + [(d_post[0], l_post[0])]
    ew_hid = jnp.stack([_block_diag(dw, lw)
                        for (dw, _), (lw, _) in hid_pairs])              # [4, 64, 64]
    eb_hid = jnp.stack([jnp.concatenate([db, lb], axis=1)
                        for (_, db), (_, lb) in hid_pairs])              # [4, 1, 64]

    ew_out = _block_diag(d_post[1][0], l_post[1][0])                     # [64, 96]
    eb_out = jnp.concatenate([d_post[1][1], l_post[1][1]], axis=1)       # [1, 96]

    (fcw, fcb), (w1, b1), (wo, bo) = dec
    return dict(ew_in=ew_in, eb_in=eb_in, ew_hid=ew_hid, eb_hid=eb_hid,
                ew_out=ew_out, eb_out=eb_out,
                dw_th=fcw[:DIM_HID],
                dw_z=fcw[DIM_HID:DIM_HID + DIM_LAT],
                dw_x=fcw[DIM_HID + DIM_LAT:],
                db0=fcb, dw1=w1, db1=b1, dwo=wo, dbo=bo)


# ---------------------------------------------------------------------------
# pure-JAX reference (mirrors the PyTorch module on the raw params)
# ---------------------------------------------------------------------------
def _mlp_ref(h, layers):
    for i, (w, b) in enumerate(layers):
        h = h @ w + b
        if i < len(layers) - 1:
            h = jnp.maximum(h, 0.0)
    return h


def _pool_enc_ref(xy, layers):
    h = _mlp_ref(xy, layers[:ENC_PRE_DEPTH])
    return _mlp_ref(jnp.mean(h, axis=-2), layers[ENC_PRE_DEPTH:])


def _lenc_dist_ref(params, x, y):
    out = _pool_enc_ref(jnp.concatenate([x, y], axis=-1), params['lenc'])
    return out[:, :DIM_LAT], 0.1 + 0.9 * jax.nn.sigmoid(out[:, DIM_LAT:])


def _decoder_ll_ref(params, theta, z, x, y):
    B, N, _ = x.shape
    enc = jnp.concatenate([theta, z], axis=-1)
    enc = jnp.broadcast_to(enc[:, None, :], (B, N, enc.shape[-1]))
    out = _mlp_ref(jnp.concatenate([enc, x], axis=-1), params['dec'])
    mu, raw = out[..., :DIM_Y], out[..., DIM_Y:]
    sigma = 0.1 + 0.9 * jax.nn.softplus(raw)
    logp = -0.5 * ((y - mu) / sigma) ** 2 - jnp.log(sigma) - _HALF_LOG_2PI
    return jnp.sum(logp, axis=-1)


def np_forward_eval_ref(params, xc, yc, x, y, z_key):
    eps = jax.random.normal(z_key, (xc.shape[0], DIM_LAT), jnp.float32)
    pmu, psig = _lenc_dist_ref(params, xc, yc)
    z = pmu + psig * eps
    theta = _pool_enc_ref(jnp.concatenate([xc, yc], axis=-1), params['denc'])
    ll = _decoder_ll_ref(params, theta, z, x, y)
    Nc = xc.shape[1]
    return jnp.mean(ll[:, :Nc]), jnp.mean(ll[:, Nc:])


def np_forward_train_ref(params, xc, yc, x, y, z_key):
    eps = jax.random.normal(z_key, (xc.shape[0], DIM_LAT), jnp.float32)
    pmu, psig = _lenc_dist_ref(params, xc, yc)
    qmu, qsig = _lenc_dist_ref(params, x, y)
    z = qmu + qsig * eps
    theta = _pool_enc_ref(jnp.concatenate([xc, yc], axis=-1), params['denc'])
    recon = jnp.mean(_decoder_ll_ref(params, theta, z, x, y))
    kl = (jnp.log(psig / qsig)
          + (qsig ** 2 + (qmu - pmu) ** 2) / (2.0 * psig ** 2) - 0.5)
    kld = jnp.mean(jnp.sum(kl, axis=-1))
    return -recon + kld / x.shape[1], recon, kld


# ---------------------------------------------------------------------------
if __name__ == "__main__":
    key = jax.random.PRNGKey(0)
    k_par, k_xc, k_yc, k_xt, k_yt, k_z = jax.random.split(key, 6)

    B, Nc, Nt = 2, 8, 8
    params = init_np_params(k_par)
    packed = pack_np_params(params)          # pack once, reuse every call

    xc = jax.random.normal(k_xc, (B, Nc, DIM_X), jnp.float32)
    yc = jax.random.normal(k_yc, (B, Nc, DIM_Y), jnp.float32)
    xt = jax.random.normal(k_xt, (B, Nt, DIM_X), jnp.float32)
    yt = jax.random.normal(k_yt, (B, Nt, DIM_Y), jnp.float32)
    x = jnp.concatenate([xc, xt], axis=-2)   # [B, Nc+Nt, dx]
    y = jnp.concatenate([yc, yt], axis=-2)

    eval_fn = jax.jit(np_forward_eval)
    train_fn = jax.jit(np_forward_train)

    ctx_ll, tar_ll = eval_fn(packed, xc, yc, x, y, k_z)
    loss, recon, kld = train_fn(packed, xc, yc, x, y, k_z)
    jax.block_until_ready((ctx_ll, tar_ll, loss, recon, kld))

    # correctness vs. pure-JAX reference (loose tol: approx reciprocal on EUP)
    ref_ctx, ref_tar = np_forward_eval_ref(params, xc, yc, x, y, k_z)
    ref_loss, ref_recon, ref_kld = np_forward_train_ref(params, xc, yc, x, y, k_z)
    np.testing.assert_allclose(np.array([ctx_ll, tar_ll]),
                               np.array([ref_ctx, ref_tar]),
                               rtol=1e-2, atol=1e-2)
    np.testing.assert_allclose(np.array([loss, recon, kld]),
                               np.array([ref_loss, ref_recon, ref_kld]),
                               rtol=1e-2, atol=1e-2)
    print("KERNEL_OK")
</pallas_src>

<mosaic_0001>
module attributes {stable_mosaic.version = 11 : i64} {
  func.func @_np_eval_kernel(%arg0: memref<48x2xf32, #tpu.memory_space<vmem>>, %arg1: memref<2x16xf32, #tpu.memory_space<vmem>>, %arg2: memref<32x2xf32, #tpu.memory_space<vmem>>, %arg3: memref<32x2xf32, #tpu.memory_space<vmem>>, %arg4: memref<2x32xf32, #tpu.memory_space<vmem>>, %arg5: memref<2x64xf32, #tpu.memory_space<vmem>>, %arg6: memref<1x64xf32, #tpu.memory_space<vmem>>, %arg7: memref<4x64x64xf32, #tpu.memory_space<vmem>>, %arg8: memref<4x1x64xf32, #tpu.memory_space<vmem>>, %arg9: memref<64x96xf32, #tpu.memory_space<vmem>>, %arg10: memref<1x96xf32, #tpu.memory_space<vmem>>, %arg11: memref<32x32xf32, #tpu.memory_space<vmem>>, %arg12: memref<32x32xf32, #tpu.memory_space<vmem>>, %arg13: memref<1x32xf32, #tpu.memory_space<vmem>>, %arg14: memref<1x32xf32, #tpu.memory_space<vmem>>, %arg15: memref<32x32xf32, #tpu.memory_space<vmem>>, %arg16: memref<1x32xf32, #tpu.memory_space<vmem>>, %arg17: memref<32x2xf32, #tpu.memory_space<vmem>>, %arg18: memref<1x2xf32, #tpu.memory_space<vmem>>, %arg19: memref<1x2xf32, #tpu.memory_space<vmem>>) attributes {dimension_semantics = [], scalar_prefetch = 0 : i64, scratch_operands = 0 : i64, tpu.core_type = #tpu.core_type<tc>} {
    %c0 = arith.constant 0 : index
    %c0_0 = arith.constant 0 : index
    %0 = vector.load %arg0[%c0, %c0_0] : memref<48x2xf32, #tpu.memory_space<vmem>>, vector<16x2xf32>
    %c0_1 = arith.constant 0 : index
    %c0_2 = arith.constant 0 : index
    %1 = vector.load %arg5[%c0_1, %c0_2] : memref<2x64xf32, #tpu.memory_space<vmem>>, vector<2x64xf32>
    %cst = arith.constant dense<0.000000e+00> : vector<16x64xf32>
    %2 = tpu.matmul %0, %1, %cst {dimension_numbers = #tpu.dot_dimension_numbers<[1], [0], [0], [1], [0, 0, 1, 1], [], []>} : vector<16x2xf32>, vector<2x64xf32>, vector<16x64xf32> -> vector<16x64xf32>
    %c0_3 = arith.constant 0 : index
    %c0_4 = arith.constant 0 : index
    %3 = vector.load %arg6[%c0_3, %c0_4] : memref<1x64xf32, #tpu.memory_space<vmem>>, vector<1x64xf32>
    %4 = vector.broadcast %3 : vector<1x64xf32> to vector<16x64xf32>
    %5 = arith.addf %2, %4 : vector<16x64xf32>
    %cst_5 = arith.constant 0.000000e+00 : f32
    %6 = vector.broadcast %cst_5 : f32 to vector<16x64xf32>
    %7 = arith.maximumf %5, %6 : vector<16x64xf32>
    %c0_6 = arith.constant 0 : index
    %c0_7 = arith.constant 0 : index
    %c0_8 = arith.constant 0 : index
    %8 = vector.load %arg7[%c0_6, %c0_7, %c0_8] : memref<4x64x64xf32, #tpu.memory_space<vmem>>, vector<1x64x64xf32>
    %9 = vector.shape_cast %8 : vector<1x64x64xf32> to vector<64x64xf32>
    %cst_9 = arith.constant dense<0.000000e+00> : vector<16x64xf32>
    %10 = tpu.matmul %7, %9, %cst_9 {dimension_numbers = #tpu.dot_dimension_numbers<[1], [0], [0], [1], [0, 0, 1, 1], [], []>} : vector<16x64xf32>, vector<64x64xf32>, vector<16x64xf32> -> vector<16x64xf32>
    %c0_10 = arith.constant 0 : index
    %c0_11 = arith.constant 0 : index
    %c0_12 = arith.constant 0 : index
    %11 = vector.load %arg8[%c0_10, %c0_11, %c0_12] : memref<4x1x64xf32, #tpu.memory_space<vmem>>, vector<1x1x64xf32>
    %12 = vector.shape_cast %11 : vector<1x1x64xf32> to vector<1x64xf32>
    %13 = vector.broadcast %12 : vector<1x64xf32> to vector<16x64xf32>
    %14 = arith.addf %10, %13 : vector<16x64xf32>
    %cst_13 = arith.constant 0.000000e+00 : f32
    %15 = vector.broadcast %cst_13 : f32 to vector<16x64xf32>
    %16 = arith.maximumf %14, %15 : vector<16x64xf32>
    %c1 = arith.constant 1 : index
    %c0_14 = arith.constant 0 : index
    %c0_15 = arith.constant 0 : index
    %17 = vector.load %arg7[%c1, %c0_14, %c0_15] : memref<4x64x64xf32, #tpu.memory_space<vmem>>, vector<1x64x64xf32>
    %18 = vector.shape_cast %17 : vector<1x64x64xf32> to vector<64x64xf32>
    %cst_16 = arith.constant dense<0.000000e+00> : vector<16x64xf32>
    %19 = tpu.matmul %16, %18, %cst_16 {dimension_numbers = #tpu.dot_dimension_numbers<[1], [0], [0], [1], [0, 0, 1, 1], [], []>} : vector<16x64xf32>, vector<64x64xf32>, vector<16x64xf32> -> vector<16x64xf32>
    %c1_17 = arith.constant 1 : index
    %c0_18 = arith.constant 0 : index
    %c0_19 = arith.constant 0 : index
    %20 = vector.load %arg8[%c1_17, %c0_18, %c0_19] : memref<4x1x64xf32, #tpu.memory_space<vmem>>, vector<1x1x64xf32>
    %21 = vector.shape_cast %20 : vector<1x1x64xf32> to vector<1x64xf32>
    %22 = vector.broadcast %21 : vector<1x64xf32> to vector<16x64xf32>
    %23 = arith.addf %19, %22 : vector<16x64xf32>
    %cst_20 = arith.constant 0.000000e+00 : f32
    %24 = vector.broadcast %cst_20 : f32 to vector<16x64xf32>
    %25 = arith.maximumf %23, %24 : vector<16x64xf32>
    %c2 = arith.constant 2 : index
    %c0_21 = arith.constant 0 : index
    %c0_22 = arith.constant 0 : index
    %26 = vector.load %arg7[%c2, %c0_21, %c0_22] : memref<4x64x64xf32, #tpu.memory_space<vmem>>, vector<1x64x64xf32>
    %27 = vector.shape_cast %26 : vector<1x64x64xf32> to vector<64x64xf32>
    %cst_23 = arith.constant dense<0.000000e+00> : vector<16x64xf32>
    %28 = tpu.matmul %25, %27, %cst_23 {dimension_numbers = #tpu.dot_dimension_numbers<[1], [0], [0], [1], [0, 0, 1, 1], [], []>} : vector<16x64xf32>, vector<64x64xf32>, vector<16x64xf32> -> vector<16x64xf32>
    %c2_24 = arith.constant 2 : index
    %c0_25 = arith.constant 0 : index
    %c0_26 = arith.constant 0 : index
    %29 = vector.load %arg8[%c2_24, %c0_25, %c0_26] : memref<4x1x64xf32, #tpu.memory_space<vmem>>, vector<1x1x64xf32>
    %30 = vector.shape_cast %29 : vector<1x1x64xf32> to vector<1x64xf32>
    %31 = vector.broadcast %30 : vector<1x64xf32> to vector<16x64xf32>
    %32 = arith.addf %28, %31 : vector<16x64xf32>
    %c0_27 = arith.constant 0 : index
    %c0_28 = arith.constant 0 : index
    %33 = vector.load %arg1[%c0_27, %c0_28] : memref<2x16xf32, #tpu.memory_space<vmem>>, vector<2x16xf32>
    %cst_29 = arith.constant dense<0.000000e+00> : vector<2x64xf32>
    %34 = tpu.matmul %33, %32, %cst_29 {dimension_numbers = #tpu.dot_dimension_numbers<[1], [0], [0], [1], [0, 0, 1, 1], [], []>} : vector<2x16xf32>, vector<16x64xf32>, vector<2x64xf32> -> vector<2x64xf32>
    %c3 = arith.constant 3 : index
    %c0_30 = arith.constant 0 : index
    %c0_31 = arith.constant 0 : index
    %35 = vector.load %arg7[%c3, %c0_30, %c0_31] : memref<4x64x64xf32, #tpu.memory_space<vmem>>, vector<1x64x64xf32>
    %36 = vector.shape_cast %35 : vector<1x64x64xf32> to vector<64x64xf32>
    %cst_32 = arith.constant dense<0.000000e+00> : vector<2x64xf32>
    %37 = tpu.matmul %34, %36, %cst_32 {dimension_numbers = #tpu.dot_dimension_numbers<[1], [0], [0], [1], [0, 0, 1, 1], [], []>} : vector<2x64xf32>, vector<64x64xf32>, vector<2x64xf32> -> vector<2x64xf32>
    %c3_33 = arith.constant 3 : index
    %c0_34 = arith.constant 0 : index
    %c0_35 = arith.constant 0 : index
    %38 = vector.load %arg8[%c3_33, %c0_34, %c0_35] : memref<4x1x64xf32, #tpu.memory_space<vmem>>, vector<1x1x64xf32>
    %39 = vector.shape_cast %38 : vector<1x1x64xf32> to vector<1x64xf32>
    %40 = vector.broadcast %39 : vector<1x64xf32> to vector<2x64xf32>
    %41 = arith.addf %37, %40 : vector<2x64xf32>
    %cst_36 = arith.constant 0.000000e+00 : f32
    %42 = vector.broadcast %cst_36 : f32 to vector<2x64xf32>
    %43 = arith.maximumf %41, %42 : vector<2x64xf32>
    %c0_37 = arith.constant 0 : index
    %c0_38 = arith.constant 0 : index
    %44 = vector.load %arg9[%c0_37, %c0_38] : memref<64x96xf32, #tpu.memory_space<vmem>>, vector<64x96xf32>
    %cst_39 = arith.constant dense<0.000000e+00> : vector<2x96xf32>
    %45 = tpu.matmul %43, %44, %cst_39 {dimension_numbers = #tpu.dot_dimension_numbers<[1], [0], [0], [1], [0, 0, 1, 1], [], []>} : vector<2x64xf32>, vector<64x96xf32>, vector<2x96xf32> -> vector<2x96xf32>
    %c0_40 = arith.constant 0 : index
    %c0_41 = arith.constant 0 : index
    %46 = vector.load %arg10[%c0_40, %c0_41] : memref<1x96xf32, #tpu.memory_space<vmem>>, vector<1x96xf32>
    %47 = vector.broadcast %46 : vector<1x96xf32> to vector<2x96xf32>
    %48 = arith.addf %45, %47 : vector<2x96xf32>
    %49 = vector.extract_strided_slice %48 {offsets = [0, 0], sizes = [2, 32], strides = [1, 1]} : vector<2x96xf32> to vector<2x32xf32>
    %50 = vector.extract_strided_slice %48 {offsets = [0, 32], sizes = [2, 32], strides = [1, 1]} : vector<2x96xf32> to vector<2x32xf32>
    %51 = vector.extract_strided_slice %48 {offsets = [0, 64], sizes = [2, 32], strides = [1, 1]} : vector<2x96xf32> to vector<2x32xf32>
    %52 = arith.negf %51 : vector<2x32xf32>
    %53 = math.exp %52 : vector<2x32xf32>
    %cst_42 = arith.constant 1.000000e+00 : f32
    %54 = vector.broadcast %cst_42 : f32 to vector<2x32xf32>
    %55 = arith.addf %54, %53 : vector<2x32xf32>
    %56 = arith.divf %54, %55 : vector<2x32xf32>
    %cst_43 = arith.constant 0.899999976 : f32
    %57 = vector.broadcast %cst_43 : f32 to vector<2x32xf32>
    %58 = arith.mulf %57, %56 : vector<2x32xf32>
    %cst_44 = arith.constant 1.000000e-01 : f32
    %59 = vector.broadcast %cst_44 : f32 to vector<2x32xf32>
    %60 = arith.addf %59, %58 : vector<2x32xf32>
    %c0_45 = arith.constant 0 : index
    %c0_46 = arith.constant 0 : index
    %61 = vector.load %arg4[%c0_45, %c0_46] : memref<2x32xf32, #tpu.memory_space<vmem>>, vector<2x32xf32>
    %62 = arith.mulf %60, %61 : vector<2x32xf32>
    %63 = arith.addf %50, %62 : vector<2x32xf32>
    %c16 = arith.constant 16 : index
    %c0_47 = arith.constant 0 : index
    %64 = vector.load %arg0[%c16, %c0_47] : memref<48x2xf32, #tpu.memory_space<vmem>>, vector<32x2xf32>
    %65 = vector.extract_strided_slice %64 {offsets = [0, 0], sizes = [32, 1], strides = [1, 1]} : vector<32x2xf32> to vector<32x1xf32>
    %66 = vector.extract_strided_slice %64 {offsets = [0, 1], sizes = [32, 1], strides = [1, 1]} : vector<32x2xf32> to vector<32x1xf32>
    %c0_48 = arith.constant 0 : index
    %c0_49 = arith.constant 0 : index
    %67 = vector.load %arg2[%c0_48, %c0_49] : memref<32x2xf32, #tpu.memory_space<vmem>>, vector<32x2xf32>
    %c0_50 = arith.constant 0 : index
    %c0_51 = arith.constant 0 : index
    %68 = vector.load %arg11[%c0_50, %c0_51] : memref<32x32xf32, #tpu.memory_space<vmem>>, vector<32x32xf32>
    %cst_52 = arith.constant dense<0.000000e+00> : vector<2x32xf32>
    %69 = tpu.matmul %49, %68, %cst_52 {dimension_numbers = #tpu.dot_dimension_numbers<[1], [0], [0], [1], [0, 0, 1, 1], [], []>} : vector<2x32xf32>, vector<32x32xf32>, vector<2x32xf32> -> vector<2x32xf32>
    %c0_53 = arith.constant 0 : index
    %c0_54 = arith.constant 0 : index
    %70 = vector.load %arg12[%c0_53, %c0_54] : memref<32x32xf32, #tpu.memory_space<vmem>>, vector<32x32xf32>
    %cst_55 = arith.constant dense<0.000000e+00> : vector<2x32xf32>
    %71 = tpu.matmul %63, %70, %cst_55 {dimension_numbers = #tpu.dot_dimension_numbers<[1], [0], [0], [1], [0, 0, 1, 1], [], []>} : vector<2x32xf32>, vector<32x32xf32>, vector<2x32xf32> -> vector<2x32xf32>
    %72 = arith.addf %69, %71 : vector<2x32xf32>
    %c0_56 = arith.constant 0 : index
    %c0_57 = arith.constant 0 : index
    %73 = vector.load %arg14[%c0_56, %c0_57] : memref<1x32xf32, #tpu.memory_space<vmem>>, vector<1x32xf32>
    %74 = vector.broadcast %73 : vector<1x32xf32> to vector<2x32xf32>
    %75 = arith.addf %72, %74 : vector<2x32xf32>
    %c0_58 = arith.constant 0 : index
    %c0_59 = arith.constant 0 : index
    %76 = vector.load %arg13[%c0_58, %c0_59] : memref<1x32xf32, #tpu.memory_space<vmem>>, vector<1x32xf32>
    %cst_60 = arith.constant dense<0.000000e+00> : vector<32x32xf32>
    %77 = tpu.matmul %65, %76, %cst_60 {dimension_numbers = #tpu.dot_dimension_numbers<[1], [0], [0], [1], [0, 0, 1, 1], [], []>} : vector<32x1xf32>, vector<1x32xf32>, vector<32x32xf32> -> vector<32x32xf32>
    %cst_61 = arith.constant dense<0.000000e+00> : vector<32x32xf32>
    %78 = tpu.matmul %67, %75, %cst_61 {dimension_numbers = #tpu.dot_dimension_numbers<[1], [0], [0], [1], [0, 0, 1, 1], [], []>} : vector<32x2xf32>, vector<2x32xf32>, vector<32x32xf32> -> vector<32x32xf32>
    %79 = arith.addf %77, %78 : vector<32x32xf32>
    %cst_62 = arith.constant 0.000000e+00 : f32
    %80 = vector.broadcast %cst_62 : f32 to vector<32x32xf32>
    %81 = arith.maximumf %79, %80 : vector<32x32xf32>
    %c0_63 = arith.constant 0 : index
    %c0_64 = arith.constant 0 : index
    %82 = vector.load %arg15[%c0_63, %c0_64] : memref<32x32xf32, #tpu.memory_space<vmem>>, vector<32x32xf32>
    %cst_65 = arith.constant dense<0.000000e+00> : vector<32x32xf32>
    %83 = tpu.matmul %81, %82, %cst_65 {dimension_numbers = #tpu.dot_dimension_numbers<[1], [0], [0], [1], [0, 0, 1, 1], [], []>} : vector<32x32xf32>, vector<32x32xf32>, vector<32x32xf32> -> vector<32x32xf32>
    %c0_66 = arith.constant 0 : index
    %c0_67 = arith.constant 0 : index
    %84 = vector.load %arg16[%c0_66, %c0_67] : memref<1x32xf32, #tpu.memory_space<vmem>>, vector<1x32xf32>
    %85 = vector.broadcast %84 : vector<1x32xf32> to vector<32x32xf32>
    %86 = arith.addf %83, %85 : vector<32x32xf32>
    %cst_68 = arith.constant 0.000000e+00 : f32
    %87 = vector.broadcast %cst_68 : f32 to vector<32x32xf32>
    %88 = arith.maximumf %86, %87 : vector<32x32xf32>
    %c0_69 = arith.constant 0 : index
    %c0_70 = arith.constant 0 : index
    %89 = vector.load %arg17[%c0_69, %c0_70] : memref<32x2xf32, #tpu.memory_space<vmem>>, vector<32x2xf32>
    %cst_71 = arith.constant dense<0.000000e+00> : vector<32x2xf32>
    %90 = tpu.matmul %88, %89, %cst_71 {dimension_numbers = #tpu.dot_dimension_numbers<[1], [0], [0], [1], [0, 0, 1, 1], [], []>} : vector<32x32xf32>, vector<32x2xf32>, vector<32x2xf32> -> vector<32x2xf32>
    %c0_72 = arith.constant 0 : index
    %c0_73 = arith.constant 0 : index
    %91 = vector.load %arg18[%c0_72, %c0_73] : memref<1x2xf32, #tpu.memory_space<vmem>>, vector<1x2xf32>
    %92 = vector.broadcast %91 : vector<1x2xf32> to vector<32x2xf32>
    %93 = arith.addf %90, %92 : vector<32x2xf32>
    %94 = vector.extract_strided_slice %93 {offsets = [0, 0], sizes = [32, 1], strides = [1, 1]} : vector<32x2xf32> to vector<32x1xf32>
    %95 = vector.extract_strided_slice %93 {offsets = [0, 1], sizes = [32, 1], strides = [1, 1]} : vector<32x2xf32> to vector<32x1xf32>
    %cst_74 = arith.constant 0.000000e+00 : f32
    %96 = vector.broadcast %cst_74 : f32 to vector<32x1xf32>
    %97 = arith.maximumf %95, %96 : vector<32x1xf32>
    %98 = vector.broadcast %cst_74 : f32 to vector<32x1xf32>
    %99 = arith.subf %95, %98 : vector<32x1xf32>
    %100 = arith.cmpf one, %99, %99 : vector<32x1xf32>
    %101 = vector.broadcast %cst_74 : f32 to vector<32x1xf32>
    %102 = arith.addf %95, %101 : vector<32x1xf32>
    %103 = math.absf %99 : vector<32x1xf32>
    %cst_75 = arith.constant 0.000000e+00 : f32
    %104 = vector.broadcast %cst_75 : f32 to vector<32x1xf32>
    %105 = arith.subf %104, %103 : vector<32x1xf32>
    %106 = math.exp %105 : vector<32x1xf32>
    %107 = math.log1p %106 : vector<32x1xf32>
    %108 = arith.addf %97, %107 : vector<32x1xf32>
    %109 = arith.select %100, %102, %108 : vector<32x1xi1>, vector<32x1xf32>
    %cst_76 = arith.constant 0.899999976 : f32
    %110 = vector.broadcast %cst_76 : f32 to vector<32x1xf32>
    %111 = arith.mulf %110, %109 : vector<32x1xf32>
    %cst_77 = arith.constant 1.000000e-01 : f32
    %112 = vector.broadcast %cst_77 : f32 to vector<32x1xf32>
    %113 = arith.addf %112, %111 : vector<32x1xf32>
    %114 = tpu.reciprocal %113 {approx = true} : vector<32x1xf32> -> vector<32x1xf32>
    %115 = arith.subf %66, %94 : vector<32x1xf32>
    %116 = arith.mulf %115, %114 : vector<32x1xf32>
    %cst_78 = arith.constant -5.000000e-01 : f32
    %117 = vector.broadcast %cst_78 : f32 to vector<32x1xf32>
    %118 = arith.mulf %117, %116 : vector<32x1xf32>
    %119 = arith.mulf %118, %116 : vector<32x1xf32>
    %120 = math.log %113 : vector<32x1xf32>
    %121 = arith.subf %119, %120 : vector<32x1xf32>
    %cst_79 = arith.constant 0.918938517 : f32
    %122 = vector.broadcast %cst_79 : f32 to vector<32x1xf32>
    %123 = arith.subf %121, %122 : vector<32x1xf32>
    %cst_80 = arith.constant dense<0.000000e+00> : vector<32xf32>
    %124 = vector.multi_reduction <add>, %123, %cst_80 [1] : vector<32x1xf32> to vector<32xf32>
    %125 = vector.shape_cast %124 : vector<32xf32> to vector<32x1xf32>
    %c0_81 = arith.constant 0 : index
    %c0_82 = arith.constant 0 : index
    %126 = vector.load %arg3[%c0_81, %c0_82] : memref<32x2xf32, #tpu.memory_space<vmem>>, vector<32x2xf32>
    %127 = vector.broadcast %125 : vector<32x1xf32> to vector<32x2xf32>
    %128 = arith.mulf %127, %126 : vector<32x2xf32>
    %cst_83 = arith.constant dense<0.000000e+00> : vector<2xf32>
    %129 = vector.multi_reduction <add>, %128, %cst_83 [0] : vector<32x2xf32> to vector<2xf32>
    %130 = vector.shape_cast %129 : vector<2xf32> to vector<1x2xf32>
    %c0_84 = arith.constant 0 : index
    %c0_85 = arith.constant 0 : index
    %131 = vector.load %arg19[%c0_84, %c0_85] : memref<1x2xf32, #tpu.memory_space<vmem>>, vector<1x2xf32>
    tpu.vector_store %arg19[%c0_84, %c0_85], %130 {strides = array<i32>} : memref<1x2xf32, #tpu.memory_space<vmem>>, vector<1x2xf32>,
    return
  }
}

</mosaic_0001>

<bundles_post_ra>
// kernel: np_forward_eval.1
= control target key start
LH: loop header
LB: loop body
LE: loop exit
PB: predicated region body
PF: predicated region fallthrough
CT: control target
= control target key end

     0   :  { %s1427_s0 = inlined_call_operand.vmem [shape: f32[48,2], index: 0, kind: input, shape index: {}]   ;;  %s1428_s1 = inlined_call_operand.vmem [shape: f32[2,16], index: 1, kind: input, shape index: {}]   ;;  %s1429_s2 = inlined_call_operand.hbm [shape: f32[32,2], index: 2, kind: input, shape index: {}]   ;;  %s1430_s3 = inlined_call_operand.hbm [shape: f32[32,2], index: 3, kind: input, shape index: {}]   ;;  %s1431_s4 = inlined_call_operand.vmem [shape: f32[2,32], index: 4, kind: input, shape index: {}]   ;;  %s1432_s5 = inlined_call_operand.vmem [shape: f32[2,64], index: 5, kind: input, shape index: {}]   ;;  %s1433_s6 = inlined_call_operand.vmem [shape: f32[1,64], index: 6, kind: input, shape index: {}]   ;;  %s1434_s7 = inlined_call_operand.hbm [shape: f32[4,64,64], index: 7, kind: input, shape index: {}]   ;;  %s1435_s8 = inlined_call_operand.vmem [shape: f32[4,1,64], index: 8, kind: input, shape index: {}]   ;;  %s1436_s9 = inlined_call_operand.vmem [shape: f32[64,96], index: 9, kind: input, shape index: {}]   ;;  %s1437_s10 = inlined_call_operand.vmem [shape: f32[1,96], index: 10, kind: input, shape index: {}]   ;;  %s1438_s11 = inlined_call_operand.vmem [shape: f32[32,32], index: 11, kind: input, shape index: {}]   ;;  %s1439_s12 = inlined_call_operand.hbm [shape: f32[32,32], index: 12, kind: input, shape index: {}]   ;;  %s1440_s13 = inlined_call_operand.vmem [shape: f32[1,32], index: 13, kind: input, shape index: {}]   ;;  %s1441_s14 = inlined_call_operand.vmem [shape: f32[1,32], index: 14, kind: input, shape index: {}]   ;;  %s1442_s15 = inlined_call_operand.hbm [shape: f32[32,32], index: 15, kind: input, shape index: {}]   ;;  %s1443_s16 = inlined_call_operand.vmem [shape: f32[1,32], index: 16, kind: input, shape index: {}]   ;;  %s1444_s17 = inlined_call_operand.vmem [shape: f32[32,2], index: 17, kind: input, shape index: {}]   ;;  %s1445_s18 = inlined_call_operand.vmem [shape: f32[1,2], index: 18, kind: input, shape index: {}]   ;;  %s1446_s19 = inlined_call_operand.vmem [shape: f32[1,2], index: 19, kind: output, shape index: {}]  }
   0x1   :  { %1448 = sst [smem:[#allocation13_spill]] %s1427_s0 }
   0x2   :  { %1449 = sst [smem:[#allocation14_spill]] %s1428_s1 }
   0x3   :  { %1450 = sst [smem:[#allocation15_spill]] %s1429_s2 }
   0x4   :  { %1451 = sst [smem:[#allocation16_spill]] %s1430_s3 }
   0x5   :  { %1452 = sst [smem:[#allocation17_spill]] %s1445_s18 }
   0x6   :  { %1453 = sst [smem:[#allocation18_spill]] %s1446_s19 }
   0x7   :  { %24 = vsyncpa [#allocation3], 0 }
   0x8   :  { %25 = vsyncpa [#allocation5], 0 }
   0x9   :  { %26 = vsyncpa [#allocation8], 0  ;;  %s1454_s20 = sld [smem:[#allocation16_spill]]  ;;  %s1123_s1 = smov [#allocation4]  }
   0xa   :  { %s50_s22 = sshll.u32 %s1123_s1, 4  ;;  %s88_s24 = sshll.u32 %s1439_s12, 4  ;;  %s51_s22 = int_to_ptr.vmem [resolvable:$true] %s50_s22  ;;  %s89_s24 = int_to_ptr.hbm [resolvable:$true] %s88_s24 }
   0xb   :  { %s1124_s25 = smov 128   ;;  %s1125_s3 = smov 8  }
   0xc   :  { %s1126_s26 = smov [#allocation7]   ;;  %s1455_s19 = sld [smem:[#allocation15_spill]] }
   0xd   :  { %s90_s27 = sshll.u32 %s1126_s26, 4  ;;  %s1127_s1 = smov [#allocation2]   ;;  %s91_s27 = int_to_ptr.vmem [resolvable:$true] %s90_s27 }
   0xe   :  { %96 = dma.hbm_to_vmem [thread:$0]  %s89_s24, 512, %s91_s27, [#allocation8], %s1124_s25, %s1124_s25, %s1125_s3  }
   0xf   :  { %s48_s21 = sshll.u32 %s1454_s20, 4  ;;  %s67_s20 = sshll.u32 %s1434_s7, 4  ;;  %s49_s21 = int_to_ptr.hbm [resolvable:$true] %s48_s21  ;;  %s68_s20 = int_to_ptr.hbm [resolvable:$true] %s67_s20 }
  0x10   :  { %56 = dma.hbm_to_vmem [thread:$0]  %s49_s21, 512, %s51_s22, [#allocation5], %s1124_s25, %s1124_s25, %s1125_s3  }
  0x11   :  { %s37_s2 = sshll.u32 %s1127_s1, 4  ;;  %s1128_s12 = smov [#allocation6]   ;;  %s38_s2 = int_to_ptr.vmem [resolvable:$true] %s37_s2 }
  0x12   :  { %s35_s18 = sshll.u32 %s1455_s19, 4  ;;  %s69_s21 = sshll.u32 %s1128_s12, 4  ;;  %s36_s18 = int_to_ptr.hbm [resolvable:$true] %s35_s18  ;;  %s70_s21 = int_to_ptr.vmem [resolvable:$true] %s69_s21 }
  0x13   :  { %43 = dma.hbm_to_vmem [thread:$0]  %s36_s18, 512, %s38_s2, [#allocation3], %s1124_s25, %s1124_s25, %s1125_s3  }
  0x14   :  { %s105_s26 = sshll.u32 %s1442_s15, 4  ;;  %s1129_s19 = smov [#allocation9]   ;;  %s106_s26 = int_to_ptr.hbm [resolvable:$true] %s105_s26 }
  0x15   :  { %75 = dma.hbm_to_vmem [thread:$0]  %s68_s20, 4096, %s70_s21, [#allocation5], %s1124_s25, %s1124_s25, %s1125_s3  }
  0x16   :  { %s107_s24 = sshll.u32 %s1129_s19, 4  ;;  %s108_s24 = int_to_ptr.vmem [resolvable:$true] %s107_s24 }
  0x17   :  { %113 = dma.hbm_to_vmem [thread:$0]  %s106_s26, 512, %s108_s24, [#allocation8], %s1124_s25, %s1124_s25, %s1125_s3  }
  0x18   :  { %1117 = dma.done.wait [#allocation3], 512  }
  0x19   :  { %1118 = vsyncadd [#allocation3], 4294966784 }
  0x1a   :  { %1119 = dma.done.wait [#allocation5], 4608  }
  0x1b   :  { %1120 = vsyncadd [#allocation5], 4294962688 }
  0x1c   :  { %1121 = dma.done.wait [#allocation8], 1024  }
  0x1d   :  { %1122 = vsyncadd [#allocation8], 4294966272  ;;  %vm154_vm0 = vcmask 1041408   ;;  %vm147_vm1 = vcmask 15360   ;;  %v142_v0 = vld [vmem:[%s1432_s5] sm:$0x3] }
  0x1e   :  { %s1456_s28 = sld [smem:[#allocation13_spill]]  ;;  %898 = vmatpush.msk.msra.mxu0 %vm154_vm0, %v142_v0  ;;  %v190_v2 = vld [vmem:[#allocation6 + $0x38] sm:$0xff]  ;;  %v189_v3 = vld [vmem:[#allocation6 + $0x30] sm:$0xff]  ;;  %v188_v4 = vld [vmem:[#allocation6 + $0x28] sm:$0xff]  ;;  %vm195_vm2 = vcmask 523264   ;;  %vm316_vm3 = vcmask 130048  }
  0x1f   :  { %210 = vmatpush.msra.mxu1 %v190_v2  ;;  %v187_v5 = vld [vmem:[#allocation6 + $0x20] sm:$0xff]  ;;  %v186_v7 = vld [vmem:[#allocation6 + $0x18] sm:$0xff]  ;;  %v185_v8 = vld [vmem:[#allocation6 + $0x10] sm:$0xff]  ;;  %s1457_s22 = sld [smem:[#allocation14_spill]]  ;;  %s1130_s12 = smov 64   ;;  %vm464_vm4 = vcmask 261120  }
  0x20   :  { %v184_v9 = vld [vmem:[#allocation6 + $0x8] sm:$0xff]  ;;  %v183_v10 = vld [vmem:[#allocation6] sm:$0xff]  ;;  %v235_v11 = vld [vmem:[#allocation6 + $0x78] sm:$0xff]  ;;  %vm573_vm9 = vcmask 1040384   ;;  %vm560_vm10 = vcmask 7168   ;;  %s1132_s24 = smov 1  }
  0x21   :  { %211 = vmatpush.msra.mxu1 %v189_v3  ;;  %v234_v12 = vld [vmem:[#allocation6 + $0x70] sm:$0xff]  ;;  %255 = vmatpush.msra.mxu2 %v235_v11  ;;  %v233_v13 = vld [vmem:[#allocation6 + $0x68] sm:$0xff]  ;;  %v232_v14 = vld [vmem:[#allocation6 + $0x60] sm:$0xff]  ;;  %s1459_s18 = sld [smem:[#allocation18_spill]] }
  0x22   :  { %v231_v15 = vld [vmem:[#allocation6 + $0x58] sm:$0xff]  ;;  %v952_v16 = vld [vmem:[%s1433_s6] ss:$0 sm:$0xff]  ;;  %v230_v23 = vld [vmem:[#allocation6 + $0x50] sm:$0xff] }
  0x23   :  { %212 = vmatpush.msra.mxu1 %v188_v4  ;;  %256 = vmatpush.msra.mxu2 %v234_v12  ;;  %v229_v24 = vld [vmem:[#allocation6 + $0x48] sm:$0xff]  ;;  %v228_v25 = vld [vmem:[#allocation6 + $0x40] sm:$0xff]  ;;  %v280_v26 = vld [vmem:[#allocation6 + $0xb8] sm:$0xff] }
  0x24   :  { %v140_v1 = vld [vmem:[%s1456_s28] sm:$0xff]  ;;  %v141_v6 = vld [vmem:[%s1456_s28 + $0x8] sm:$0xff]  ;;  %v279_v27 = vld [vmem:[#allocation6 + $0xb0] sm:$0xff]  ;;  %300 = vmatpush.msra.mxu3 %v280_v26 }
  0x25   :  { %899 = vmatmul.msk.f32.vlgmr.msra.gmra.mxu0 %vm147_vm1, %v140_v1  ;;  %213 = vmatpush.msra.mxu1 %v187_v5  ;;  %v278_v28 = vld [vmem:[#allocation6 + $0xa8] sm:$0xff]  ;;  %v277_v29 = vld [vmem:[#allocation6 + $0xa0] sm:$0xff]  ;;  %v276_v30 = vld [vmem:[#allocation6 + $0x98] sm:$0xff] }
  0x26   :  { %257 = vmatpush.msra.mxu2 %v233_v13  ;;  %301 = vmatpush.msra.mxu3 %v279_v27  ;;  %v953_v31 = vld [vmem:[%s1435_s8] ss:$0 sm:$0xff]  ;;  %v275_v38 = vld [vmem:[#allocation6 + $0x90] sm:$0xff]  ;;  %v274_v39 = vld [vmem:[#allocation6 + $0x88] sm:$0xff] }
  0x27   :  { %214 = vmatpush.msra.mxu1 %v186_v7  ;;  %v273_v40 = vld [vmem:[#allocation6 + $0x80] sm:$0xff]  ;;  %v348_v48 = vld [vmem:[#allocation6 + $0xf8] sm:$0xff]  ;;  %v347_v49 = vld [vmem:[#allocation6 + $0xf0] sm:$0xff] }
  0x28   :  { %258 = vmatpush.msra.mxu2 %v232_v14  ;;  %302 = vmatpush.msra.mxu3 %v278_v28  ;;  %v954_v41 = vld [vmem:[%s1435_s8 + $0x1] ss:$0 sm:$0xff]  ;;  %v346_v50 = vld [vmem:[#allocation6 + $0xe8] sm:$0xff]  ;;  %v344_v52 = vld [vmem:[#allocation6 + $0xd8] sm:$0xff] }
  0x29   :  { %215 = vmatpush.msra.mxu1 %v185_v8  ;;  %v345_v51 = vld [vmem:[#allocation6 + $0xe0] sm:$0xff]  ;;  %v343_v53 = vld [vmem:[#allocation6 + $0xd0] sm:$0xff]  ;;  %v342_v54 = vld [vmem:[#allocation6 + $0xc8] sm:$0xff] }
  0x2a   :  { %259 = vmatpush.msra.mxu2 %v231_v15  ;;  %303 = vmatpush.msra.mxu3 %v277_v29  ;;  %v955_v56 = vld [vmem:[%s1435_s8 + $0x2] ss:$0 sm:$0xff]  ;;  %v315_v60 = vld [vmem:[%s1457_s22] sm:$0x3]  ;;  %v385_v62 = vld [vmem:[%s1436_s9 + $0x38] sm:$0xff] }
  0x2b   :  { %216 = vmatpush.msra.mxu1 %v184_v9  ;;  %v341_v61 = vld [vmem:[#allocation6 + $0xc0] sm:$0xff]  ;;  %v384_v63 = vld [vmem:[%s1436_s9 + $0x30] sm:$0xff]  ;;  %v383_v0 = vld [vmem:[%s1436_s9 + $0x28] sm:$0xff] }
  0x2c   :  { %260 = vmatpush.msra.mxu2 %v230_v23  ;;  %304 = vmatpush.msra.mxu3 %v276_v30  ;;  %v382_v1 = vld [vmem:[%s1436_s9 + $0x20] sm:$0xff]  ;;  %v381_v2 = vld [vmem:[%s1436_s9 + $0x18] sm:$0xff]  ;;  %v380_v4 = vld [vmem:[%s1436_s9 + $0x10] sm:$0xff] }
  0x2d   :  { %900 = vmatmul.msk.f32.gmra.mxu0 %vm147_vm1, %v141_v6  ;;  %217 = vmatpush.msra.mxu1 %v183_v10  ;;  %v379_v5 = vld [vmem:[%s1436_s9 + $0x8] sm:$0xff]  ;;  %v378_v6 = vld [vmem:[%s1436_s9] sm:$0xff]  ;;  %v456_v12 = vld [vmem:[%s1438_s11 + $0x18] sm:$0xff] }
  0x2e   :  { %261 = vmatpush.msra.mxu2 %v229_v24  ;;  %305 = vmatpush.msra.mxu3 %v275_v38  ;;  %v434_v7 = vld [vmem:[%s1431_s4] sm:$0x3]  ;;  %v956_v8 = vld [vmem:[%s1435_s8 + $0x3] ss:$0 sm:$0xff]  ;;  %v455_v13 = vld [vmem:[%s1438_s11 + $0x10] sm:$0xff]  ;;  %s1458_s4 = sld [smem:[#allocation17_spill]] }
  0x2f   :  { %365 = vmatpush.msrb.mxu1 %v348_v48  ;;  %436 = vrot.lane.b32.xlu0 %v434_v7, %s1130_s12  ;;  %v454_v14 = vld [vmem:[%s1438_s11 + $0x8] sm:$0xff]  ;;  %v453_v15 = vld [vmem:[%s1438_s11] sm:$0xff]  ;;  %v613_v48 = vld [vmem:[#allocation9 + $0x18] sm:$0xff] }
  0x30   :  { %262 = vmatpush.msra.mxu2 %v228_v25  ;;  %306 = vmatpush.msra.mxu3 %v274_v39  ;;  %v458_v38 = vld [vmem:[#allocation7 + $0x8] sm:$0xff]  ;;  %v457_v39 = vld [vmem:[#allocation7] sm:$0xff] }
  0x31   :  { %366 = vmatpush.msrb.mxu1 %v347_v49  ;;  %v958_v49 = vld [vmem:[%s1441_s14] ss:$0 sm:$0xff] }
  0x32   :  { %307 = vmatpush.msra.mxu3 %v273_v40  ;;  %401 = vmatpush.msrb.mxu2 %v385_v62  ;;  %v666_v62 = vld [vmem:[%s1444_s17 + $0x18] sm:$0xff] }
  0x33   :  { %367 = vmatpush.msrb.mxu1 %v346_v50 }
  0x34   :  { %402 = vmatpush.msrb.mxu2 %v384_v63  ;;  %502 = vmatpush.msrb.mxu3 %v456_v12 }
  0x35   :  { %368 = vmatpush.msrb.mxu1 %v345_v51 }
  0x36   :  { %403 = vmatpush.msrb.mxu2 %v383_v0  ;;  %503 = vmatpush.msrb.mxu3 %v455_v13 }
  0x37   :  { %369 = vmatpush.msrb.mxu1 %v344_v52 }
  0x38   :  { %404 = vmatpush.msrb.mxu2 %v382_v1  ;;  %504 = vmatpush.msrb.mxu3 %v454_v14  ;;  %v665_v14 = vld [vmem:[%s1444_s17 + $0x10] sm:$0xff] }
  0x39   :  { %370 = vmatpush.msrb.mxu1 %v343_v53 }
  0x3a   :  { %405 = vmatpush.msrb.mxu2 %v381_v2  ;;  %505 = vmatpush.msrb.mxu3 %v453_v15  ;;  %v664_v15 = vld [vmem:[%s1444_s17 + $0x8] sm:$0xff] }
  0x3b   :  { %371 = vmatpush.msrb.mxu1 %v342_v54  ;;  %v449_v54 = vld [vmem:[#allocation2] sm:$0xff] }
  0x3c   :  { %406 = vmatpush.msrb.mxu2 %v380_v4 }
  0x3d   :  { %372 = vmatpush.msrb.mxu1 %v341_v61 }
  0x3e   :  { %407 = vmatpush.msrb.mxu2 %v379_v5 }
  0x40   :  { %408 = vmatpush.msrb.mxu2 %v378_v6 }
  0xa2   :  { %v175_v17 = vpop.f32.mrf.mxu0 }
  0xa3   :  { %v176_v18 = vadd.f32 %v952_v16, %v175_v17 }
  0xa5   :  { %v181_v19 = vmax.f32 %v176_v18, 0.0 }
  0xa7   :  { %901 = vmatmul.msk.f32.vlgmr.msra.gmra.mxu1 %vm195_vm2, %v181_v19 }
  0xaa   :  { %v178_v20 = vpop.f32.mrf.mxu0 }
  0xab   :  { %v179_v21 = vadd.f32 %v952_v16, %v178_v20  ;;  %v957_v16 = vld [vmem:[%s1437_s10] ss:$0 sm:$0xff]  ;;  %s1131_s10 = smov 96  }
  0xad   :  { %v182_v22 = vmax.f32 %v179_v21, 0.0 }
  0xaf   :  { %902 = vmatmul.msk.f32.gmra.mxu1 %vm195_vm2, %v182_v22 }
 0x124   :  { %v219_v32 = vpop.f32.mrf.mxu1 }
 0x125   :  { %v220_v33 = vadd.f32 %v953_v31, %v219_v32 }
 0x127   :  { %v225_v34 = vmax.f32 %v220_v33, 0.0  ;;  %v437_v33 = vpop.permute.xlu0 %436 }
 0x129   :  { %904 = vmatmul.msk.f32.vlgmr.msra.gmra.mxu2 %vm195_vm2, %v225_v34 }
 0x12a   :  { %642 = vmatpush.msra.mxu2 %v613_v48 }
 0x12c   :  { %v222_v35 = vpop.f32.mrf.mxu1 }
 0x12d   :  { %v223_v36 = vadd.f32 %v953_v31, %v222_v35 }
 0x12f   :  { %v226_v37 = vmax.f32 %v223_v36, 0.0  ;;  %v460_v36 = vld [vmem:[#allocation7 + $0x18] sm:$0xff] }
 0x131   :  { %905 = vmatmul.msk.f32.gmra.mxu2 %vm195_vm2, %v226_v37  ;;  %v459_v37 = vld [vmem:[#allocation7 + $0x10] sm:$0xff] }
 0x1ac   :  { %v264_v42 = vpop.f32.mrf.mxu2 }
 0x1ad   :  { %v265_v43 = vadd.f32 %v954_v41, %v264_v42 }
 0x1af   :  { %v270_v44 = vmax.f32 %v265_v43, 0.0  ;;  %v515_v43 = vld [vmem:[%s1440_s13] sm:$0x1] }
 0x1b0   :  { %921 = vmatpush.msk.msra.mxu1 %vm573_vm9, %v515_v43 }
 0x1b1   :  { %907 = vmatmul.msk.f32.vlgmr.msra.gmra.mxu3 %vm195_vm2, %v270_v44  ;;  %v1337_v44 = vld [vmem:[%s1456_s28 + $0x10] sm:$0xff] }
 0x1b2   :  { %695 = vmatpush.msra.mxu3 %v666_v62 }
 0x1b4   :  { %v267_v45 = vpop.f32.mrf.mxu2  ;;  %696 = vmatpush.msra.mxu3 %v665_v14 }
 0x1b5   :  { %v268_v46 = vadd.f32 %v954_v41, %v267_v45  ;;  %v1343_v45 = vld [vmem:[%s1456_s28 + $0x18] sm:$0xff] }
 0x1b6   :  { %697 = vmatpush.msra.mxu3 %v664_v15 }
 0x1b7   :  { %v271_v47 = vmax.f32 %v268_v46, 0.0  ;;  %v1349_v46 = vld [vmem:[%s1456_s28 + $0x20] sm:$0xff] }
 0x1b9   :  { %908 = vmatmul.msk.f32.gmra.mxu3 %vm195_vm2, %v271_v47  ;;  %v1355_v47 = vld [vmem:[%s1456_s28 + $0x28] sm:$0xff] }
 0x234   :  { %v309_v55 = vpop.f32.mrf.mxu3 }
 0x235   :  { %v310_v59 = vadd.f32 %v955_v56, %v309_v55  ;;  %v450_v55 = vld [vmem:[#allocation2 + $0x8] sm:$0xff] }
 0x23c   :  { %v312_v57 = vpop.f32.mrf.mxu3 }
 0x23d   :  { %v313_v58 = vadd.f32 %v955_v56, %v312_v57  ;;  %v451_v56 = vld [vmem:[#allocation2 + $0x10] sm:$0xff]  ;;  %v452_v57 = vld [vmem:[#allocation2 + $0x18] sm:$0xff] }
 0x23f   :  { %334 = vmatpush.msrb.mxu0 %v313_v58  ;;  %v612_v58 = vld [vmem:[#allocation9 + $0x10] sm:$0xff] }
 0x240   :  { %643 = vmatpush.msra.mxu2 %v612_v58 }
 0x241   :  { %335 = vmatpush.msrb.mxu0 %v310_v59  ;;  %v611_v59 = vld [vmem:[#allocation9 + $0x8] sm:$0xff] }
 0x242   :  { %909 = vmatmul.msk.f32.vlgmr.msrb.gmra.mxu0 %vm316_vm3, %v315_v60  ;;  %644 = vmatpush.msra.mxu2 %v611_v59  ;;  %v610_v60 = vld [vmem:[#allocation9] sm:$0xff] }
 0x243   :  { %479 = vmatpush.msra.mxu0 %v460_v36 }
 0x244   :  { %645 = vmatpush.msra.mxu2 %v610_v60 }
 0x245   :  { %480 = vmatpush.msra.mxu0 %v459_v37 }
 0x247   :  { %481 = vmatpush.msra.mxu0 %v458_v38 }
 0x249   :  { %482 = vmatpush.msra.mxu0 %v457_v39 }
 0x2bf   :  { %v337_v3 = vpop.f32.mrf.mxu0 }
 0x2c0   :  { %911 = vmatmul.msk.f32.vlgmr.msrb.gmra.mxu1 %vm195_vm2, %v337_v3 }
 0x2c8   :  { %922 = vmatmul.msk.f32.vlgmr.msra.gmra.mxu1 %vm560_vm10, %v1337_v44 }
 0x2d0   :  { %923 = vmatmul.msk.f32.gmra.mxu1 %vm560_vm10, %v1343_v45 }
 0x2d8   :  { %924 = vmatmul.msk.f32.gmra.mxu1 %vm560_vm10, %v1349_v46 }
 0x2e0   :  { %925 = vmatmul.msk.f32.gmra.mxu1 %vm560_vm10, %v1355_v47 }
 0x33d   :  { %v374_v9 = vpop.f32.mrf.mxu1 }
 0x33e   :  { %v375_v10 = vadd.f32 %v956_v8, %v374_v9 }
 0x340   :  { %v377_v11 = vmax.f32 %v375_v10, 0.0 }
 0x342   :  { %912 = vmatmul.msk.f32.vlgmr.msrb.gmra.mxu2 %vm195_vm2, %v377_v11 }
 0x345   :  { %v594_v61 = vpop.f32.mrf.mxu1 }
 0x34d   :  { %v597_v1 = vpop.f32.mrf.mxu1 }
 0x355   :  { %v600_v6 = vpop.f32.mrf.mxu1 }
 0x35d   :  { %v603_v10 = vpop.f32.mrf.mxu1 }
 0x3c5   :  { %v410_v17 = vpop.f32.mrf.mxu2 }
 0x3c6   :  { %v411_v18 = vadd.f32 %v957_v16, %v410_v17  ;;  %v663_v16 = vld [vmem:[%s1444_s17] sm:$0xff] }
 0x3c7   :  { %698 = vmatpush.msra.mxu3 %v663_v16  ;;  %v959_v17 = vld [vmem:[%s1443_s16] ss:$0 sm:$0xff] }
 0x3c8   :  { %v913_v19 = vmul.f32 -1.442695, %v411_v18  ;;  %915 = vmatmul.msk.f32.vlgmr.msrb.gmra.mxu3 %vm464_vm4, %v411_v18 }
 0x3ca   :  { %961 = vpow2.f32 %v913_v19 }
 0x3d0   :  { %v962_v20 = vpop.eup %961 }
 0x3d1   :  { %v416_v21 = vadd.f32 1.0, %v962_v20 }
 0x3d3   :  { %963 = vrcp.f32 %v416_v21  ;;  %v428_v25 = vand.u32 2147483648, %v416_v21  ;;  %v426_v27 = vand.u32 2147483647, %v416_v21  ;;  %vm422_vm6 = vweird.f32 %v416_v21 }
 0x3d5   :  { %v429_v29 = vor.u32 1.1754944e-38, %v428_v25  ;;  %vm427_vm8 = vcmp.eq.f32.partialorder %v426_v27, 8.507059e+37 }
 0x3d9   :  { %v964_v22 = vpop.eup %963 }
 0x3da   :  { %v418_v23 = vmul.f32 %v964_v22, %v416_v21  ;;  %vm423_vm5 = vweird.f32 %v964_v22 }
 0x3db   :  { %vm424_vm7 = vmor %vm422_vm6, %vm423_vm5 }
 0x3dc   :  { %v419_v24 = vsub.f32 1.0, %v418_v23 }
 0x3de   :  { %v420_v26 = vmul.f32 %v964_v22, %v419_v24 }
 0x3e0   :  { %v421_v28 = vadd.f32 %v964_v22, %v420_v26 }
 0x3e2   :  { %v425_v30 = vsel %vm424_vm7, %v964_v22, %v421_v28 }
 0x3e3   :  { %v430_v31 = vsel %vm427_vm8, %v429_v29, %v425_v30  ;;  %v960_v30 = vld [vmem:[%s1458_s4] ss:$0 sm:$0xff] }
 0x3e4   :  { %v432_v32 = vmul.f32 0.9, %v430_v31 }
 0x3e6   :  { %v433_v34 = vadd.f32 0.1, %v432_v32 }
 0x3e8   :  { %v439_v35 = vmul.f32 %v437_v33, %v433_v34 }
 0x3ea   :  { %441 = vrot.lane.b32.xlu0 %v439_v35, %s1131_s10 }
 0x44b   :  { %v507_v50 = vpop.f32.mrf.mxu3 }
 0x45c   :  { %v442_v40 = vpop.permute.xlu0 %441 }
 0x45d   :  { %v444_v41 = vadd.f32 %v442_v40, %v411_v18 }
 0x45f   :  { %462 = vrot.lane.b32.xlu1 %v444_v41, %s1131_s10 }
 0x4d1   :  { %v463_v42 = vpop.permute.xlu1 %462 }
 0x4d2   :  { %914 = vmatmul.msk.f32.vlgmr.msra.gmra.mxu0 %vm464_vm4, %v463_v42 }
 0x54f   :  { %v484_v51 = vpop.f32.mrf.mxu0 }
 0x550   :  { %v508_v52 = vadd.f32 %v507_v50, %v484_v51 }
 0x552   :  { %v514_v53 = vadd.f32 %v958_v49, %v508_v52 }
 0x554   :  { %916 = vmatpush.msk.msrb.mxu0 %vm154_vm0, %v514_v53 }
 0x555   :  { %917 = vmatmul.msk.f32.vlgmr.msrb.gmra.mxu0 %vm147_vm1, %v449_v54 }
 0x55d   :  { %918 = vmatmul.msk.f32.gmra.mxu0 %vm147_vm1, %v450_v55 }
 0x565   :  { %919 = vmatmul.msk.f32.gmra.mxu0 %vm147_vm1, %v451_v56 }
 0x56d   :  { %920 = vmatmul.msk.f32.gmra.mxu0 %vm147_vm1, %v452_v57 }
 0x5d2   :  { %v548_v63 = vpop.f32.mrf.mxu0 }
 0x5d3   :  { %v595_v0 = vadd.f32 %v594_v61, %v548_v63 }
 0x5d5   :  { %v606_v2 = vmax.f32 %v595_v0, 0.0 }
 0x5d7   :  { %926 = vmatmul.msk.f32.vlgmr.msra.gmra.mxu2 %vm464_vm4, %v606_v2 }
 0x5da   :  { %v551_v3 = vpop.f32.mrf.mxu0 }
 0x5db   :  { %v598_v4 = vadd.f32 %v597_v1, %v551_v3 }
 0x5dd   :  { %v607_v5 = vmax.f32 %v598_v4, 0.0 }
 0x5df   :  { %927 = vmatmul.msk.f32.gmra.mxu2 %vm464_vm4, %v607_v5 }
 0x5e2   :  { %v554_v7 = vpop.f32.mrf.mxu0 }
 0x5e3   :  { %v601_v8 = vadd.f32 %v600_v6, %v554_v7  ;;  %v1133_v6 = vmov 1  }
 0x5e4   :  { %950 = vset.pattern.permute.xlu2 %v1133_v6  ;;  %951 = vset.pattern.permute.xlu0 %v1133_v6 }
 0x5e5   :  { %v608_v9 = vmax.f32 %v601_v8, 0.0  ;;  %949 = vset.pattern.permute.xlu1 %v1133_v6 }
 0x5e7   :  { %928 = vmatmul.msk.f32.gmra.mxu2 %vm464_vm4, %v608_v9 }
 0x5ea   :  { %v557_v11 = vpop.f32.mrf.mxu0 }
 0x5eb   :  { %v604_v12 = vadd.f32 %v603_v10, %v557_v11 }
 0x5ed   :  { %v609_v13 = vmax.f32 %v604_v12, 0.0 }
 0x5ef   :  { %929 = vmatmul.msk.f32.gmra.mxu2 %vm464_vm4, %v609_v13 }
 0x65a   :  { %v647_v18 = vpop.f32.mrf.mxu2 }
 0x65b   :  { %v648_v19 = vadd.f32 %v959_v17, %v647_v18 }
 0x65d   :  { %v659_v20 = vmax.f32 %v648_v19, 0.0 }
 0x65f   :  { %930 = vmatmul.msk.f32.vlgmr.msra.gmra.mxu3 %vm464_vm4, %v659_v20 }
 0x662   :  { %v650_v21 = vpop.f32.mrf.mxu2 }
 0x663   :  { %v651_v22 = vadd.f32 %v959_v17, %v650_v21 }
 0x665   :  { %v660_v23 = vmax.f32 %v651_v22, 0.0 }
 0x667   :  { %931 = vmatmul.msk.f32.gmra.mxu3 %vm464_vm4, %v660_v23 }
 0x66a   :  { %v653_v24 = vpop.f32.mrf.mxu2 }
 0x66b   :  { %v654_v25 = vadd.f32 %v959_v17, %v653_v24 }
 0x66d   :  { %v661_v26 = vmax.f32 %v654_v25, 0.0 }
 0x66f   :  { %932 = vmatmul.msk.f32.gmra.mxu3 %vm464_vm4, %v661_v26 }
 0x672   :  { %v656_v27 = vpop.f32.mrf.mxu2 }
 0x673   :  { %v657_v28 = vadd.f32 %v959_v17, %v656_v27 }
 0x675   :  { %v662_v29 = vmax.f32 %v657_v28, 0.0 }
 0x677   :  { %933 = vmatmul.msk.f32.gmra.mxu3 %vm464_vm4, %v662_v29  ;;  %vm889_vm4 = vcmask 8192  }
 0x6e2   :  { %v700_v31 = vpop.f32.mrf.mxu3 }
 0x6e3   :  { %v1392_v32 = vadd.f32 %v960_v30, %v700_v31 }
 0x6e5   :  { %800 = vrot.lane.b32.xlu1 %v1392_v32, %s1132_s24  ;;  %v724_v48 = vand.u32 2147483647, %v1392_v32  ;;  %v712_v27 = vmax.f32 %v1392_v32, 0.0  ;;  %vm716_vm0 = vcmp.ne.f32.partialorder %v1392_v32, %v1392_v32 }
 0x6e7   :  { %v728_v51 = vsub.f32 0.0, %v724_v48 }
 0x6e9   :  { %v732_v53 = vmul.f32 1.442695, %v728_v51 }
 0x6ea   :  { %v703_v33 = vpop.f32.mrf.mxu3 }
 0x6eb   :  { %v704_v34 = vadd.f32 %v960_v30, %v703_v33 }
 0x6ed   :  { %802 = vrot.lane.b32.xlu2 %v704_v34, %s1132_s24  ;;  %v725_v39 = vand.u32 2147483647, %v704_v34  ;;  %v713_v3 = vmax.f32 %v704_v34, 0.0  ;;  %vm717_vm12 = vcmp.ne.f32.partialorder %v704_v34, %v704_v34 }
 0x6ef   :  { %v729_v40 = vsub.f32 0.0, %v725_v39 }
 0x6f1   :  { %v734_v41 = vmul.f32 1.442695, %v729_v40 }
 0x6f2   :  { %v706_v35 = vpop.f32.mrf.mxu3 }
 0x6f3   :  { %v1395_v36 = vadd.f32 %v960_v30, %v706_v35  ;;  %965 = vpow2.f32 %v734_v41 }
 0x6f5   :  { %804 = vrot.lane.b32.xlu2 %v1395_v36, %s1132_s24  ;;  %v726_v42 = vand.u32 2147483647, %v1395_v36  ;;  %v714_v16 = vmax.f32 %v1395_v36, 0.0  ;;  %vm718_vm14 = vcmp.ne.f32.partialorder %v1395_v36, %v1395_v36 }
 0x6f7   :  { %v730_v43 = vsub.f32 0.0, %v726_v42 }
 0x6f9   :  { %v736_v49 = vmul.f32 1.442695, %v730_v43  ;;  %v966_v50 = vpop.eup %965 }
 0x6fa   :  { %v709_v37 = vpop.f32.mrf.mxu3  ;;  %v749_v52 = vadd.f32 1.0, %v966_v50  ;;  %v752_v55 = vmul.f32 -0.5, %v966_v50  ;;  %v755_v59 = vand.u32 2147483647, %v966_v50 }
 0x6fb   :  { %v1398_v38 = vadd.f32 %v960_v30, %v709_v37  ;;  %967 = vpow2.f32 %v736_v49 }
 0x6fc   :  { %969 = vlog2.f32 %v749_v52  ;;  %v753_v58 = vadd.f32 1.0, %v752_v55  ;;  %vm756_vm11 = vcmp.lt.f32.partialorder %v755_v59, 0.0004427343 }
 0x6fd   :  { %806 = vrot.lane.b32.xlu0 %v1398_v38, %s1132_s24  ;;  %971 = vpow2.f32 %v732_v53  ;;  %v727_v5 = vand.u32 2147483647, %v1398_v38  ;;  %vm719_vm3 = vcmp.ne.f32.partialorder %v1398_v38, %v1398_v38 }
 0x6fe   :  { %v754_v62 = vmul.f32 %v966_v50, %v753_v58 }
 0x6ff   :  { %v731_v12 = vsub.f32 0.0, %v727_v5 }
 0x701   :  { %v968_v54 = vpop.eup %967  ;;  %v738_v18 = vmul.f32 1.442695, %v731_v12 }
 0x702   :  { %v758_v56 = vadd.f32 1.0, %v968_v54  ;;  %v970_v57 = vpop.eup %969  ;;  %v761_v63 = vmul.f32 -0.5, %v968_v54  ;;  %v764_v8 = vand.u32 2147483647, %v968_v54 }
 0x703   :  { %v972_v60 = vpop.eup %971  ;;  %v751_v61 = vmul.f32 0.6931472, %v970_v57 }
 0x704   :  { %973 = vlog2.f32 %v758_v56  ;;  %v740_v0 = vadd.f32 1.0, %v972_v60  ;;  %v762_v4 = vadd.f32 1.0, %v761_v63  ;;  %v743_v10 = vmul.f32 -0.5, %v972_v60 }
 0x705   :  { %v757_v1 = vsel %vm756_vm11, %v754_v62, %v751_v61  ;;  %vm765_vm13 = vcmp.lt.f32.partialorder %v764_v8, 0.0004427343  ;;  %v746_v20 = vand.u32 2147483647, %v972_v60 }
 0x706   :  { %975 = vlog2.f32 %v740_v0  ;;  %v777_v7 = vadd.f32 %v757_v1, %v713_v3  ;;  %v763_v11 = vmul.f32 %v968_v54, %v762_v4  ;;  %v744_v17 = vadd.f32 1.0, %v743_v10 }
 0x707   :  { %977 = vpow2.f32 %v738_v18  ;;  %vm747_vm15 = vcmp.lt.f32.partialorder %v746_v20, 0.0004427343  ;;  %v715_v4 = vmax.f32 %v1398_v38, 0.0 }
 0x708   :  { %v781_v13 = vsel %vm717_vm12, %v704_v34, %v777_v7  ;;  %v745_v23 = vmul.f32 %v972_v60, %v744_v17 }
 0x709   :  { %v785_v19 = vmul.f32 0.9, %v781_v13 }
 0x70a   :  { %v974_v2 = vpop.eup %973 }
 0x70b   :  { %v760_v9 = vmul.f32 0.6931472, %v974_v2  ;;  %v789_v24 = vadd.f32 0.1, %v785_v19 }
 0x70c   :  { %v976_v15 = vpop.eup %975 }
 0x70d   :  { %v766_v14 = vsel %vm765_vm13, %v763_v11, %v760_v9  ;;  %v742_v22 = vmul.f32 0.6931472, %v976_v15  ;;  %979 = vrcp.f32 %v789_v24  ;;  %v978_v30 = vpop.eup %977 }
 0x70e   :  { %v778_v21 = vadd.f32 %v766_v14, %v714_v16  ;;  %981 = vlog2.f32 %v789_v24  ;;  %v767_v34 = vadd.f32 1.0, %v978_v30  ;;  %v770_v49 = vmul.f32 -0.5, %v978_v30 }
 0x70f   :  { %v748_v26 = vsel %vm747_vm15, %v745_v23, %v742_v22  ;;  %v773_v58 = vand.u32 2147483647, %v978_v30 }
 0x710   :  { %v782_v25 = vsel %vm718_vm14, %v1395_v36, %v778_v21  ;;  %v776_v29 = vadd.f32 %v748_v26, %v712_v27  ;;  %v771_v57 = vadd.f32 1.0, %v770_v49  ;;  %v848_v26 = vld [vmem:[#allocation4] sm:$0xff]  ;;  %v849_v27 = vld [vmem:[#allocation4 + $0x8] sm:$0xff] }
 0x711   :  { %v786_v28 = vmul.f32 0.9, %v782_v25  ;;  %vm774_vm2 = vcmp.lt.f32.partialorder %v773_v58, 0.0004427343 }
 0x712   :  { %v780_v37 = vsel %vm716_vm0, %v1392_v32, %v776_v29  ;;  %v772_v63 = vmul.f32 %v978_v30, %v771_v57 }
 0x713   :  { %v790_v33 = vadd.f32 0.1, %v786_v28  ;;  %v980_v39 = vpop.eup %979  ;;  %v784_v41 = vmul.f32 0.9, %v780_v37 }
 0x714   :  { %v982_v40 = vpop.eup %981 }
 0x715   :  { %983 = vrcp.f32 %v790_v33  ;;  %v831_v48 = vmul.f32 0.6931472, %v982_v40  ;;  %v788_v51 = vadd.f32 0.1, %v784_v41 }
 0x716   :  { %985 = vlog2.f32 %v767_v34 }
 0x717   :  { %987 = vlog2.f32 %v790_v33 }
 0x718   :  { %989 = vrcp.f32 %v788_v51 }
 0x719   :  { %991 = vlog2.f32 %v788_v51 }
 0x71b   :  { %v984_v54 = vpop.eup %983 }
 0x747   :  { %v803_v31 = vpop.permute.xlu2 %802 }
 0x748   :  { %v813_v35 = vsub.f32 %v1343_v45, %v803_v31  ;;  %v986_v45 = vpop.eup %985  ;;  %v850_v31 = vld [vmem:[#allocation4 + $0x10] sm:$0xff] }
 0x749   :  { %v988_v56 = vpop.eup %987  ;;  %v769_v60 = vmul.f32 0.6931472, %v986_v45 }
 0x74a   :  { %v817_v36 = vmul.f32 %v980_v39, %v813_v35  ;;  %v833_v62 = vmul.f32 0.6931472, %v988_v56  ;;  %v990_v2 = vpop.eup %989  ;;  %v851_v39 = vld [vmem:[#allocation4 + $0x18] sm:$0xff] }
 0x74b   :  { %v775_v3 = vsel %vm774_vm2, %v772_v63, %v769_v60  ;;  %v992_v7 = vpop.eup %991 }
 0x74c   :  { %v821_v42 = vmul.f32 -0.5, %v817_v36  ;;  %v779_v8 = vadd.f32 %v775_v3, %v715_v4  ;;  %v829_v11 = vmul.f32 0.6931472, %v992_v7 }
 0x74e   :  { %v825_v43 = vmul.f32 %v821_v42, %v817_v36  ;;  %v783_v13 = vsel %vm719_vm3, %v1398_v38, %v779_v8 }
 0x74f   :  { %v805_v50 = vpop.permute.xlu2 %804  ;;  %v787_v14 = vmul.f32 0.9, %v783_v13 }
 0x750   :  { %v814_v52 = vsub.f32 %v1349_v46, %v805_v50  ;;  %v837_v53 = vsub.f32 %v825_v43, %v831_v48 }
 0x751   :  { %v791_v15 = vadd.f32 0.1, %v787_v14 }
 0x752   :  { %v818_v55 = vmul.f32 %v984_v54, %v814_v52  ;;  %v935_v32 = vadd.f32 -0.9189385, %v837_v53 }
 0x753   :  { %993 = vrcp.f32 %v791_v15 }
 0x754   :  { %v822_v59 = vmul.f32 -0.5, %v818_v55  ;;  %859 = vperm.xlu2 %950, %v935_v32   ;;  %995 = vlog2.f32 %v791_v15 }
 0x756   :  { %v826_v61 = vmul.f32 %v822_v59, %v818_v55 }
 0x757   :  { %v801_v0 = vpop.permute.xlu1 %800 }
 0x758   :  { %v812_v46 = vsub.f32 %v1337_v44, %v801_v0  ;;  %v838_v1 = vsub.f32 %v826_v61, %v833_v62 }
 0x759   :  { %v994_v18 = vpop.eup %993 }
 0x75a   :  { %v816_v5 = vmul.f32 %v990_v2, %v812_v46  ;;  %v936_v6 = vadd.f32 -0.9189385, %v838_v1  ;;  %v996_v20 = vpop.eup %995 }
 0x75b   :  { %v835_v23 = vmul.f32 0.6931472, %v996_v20 }
 0x75c   :  { %v820_v9 = vmul.f32 -0.5, %v816_v5  ;;  %864 = vperm.xlu0 %951, %v936_v6  }
 0x75e   :  { %v824_v10 = vmul.f32 %v820_v9, %v816_v5 }
 0x760   :  { %v836_v12 = vsub.f32 %v824_v10, %v829_v11 }
 0x762   :  { %v934_v44 = vadd.f32 -0.9189385, %v836_v12 }
 0x764   :  { %854 = vperm.xlu1 %949, %v934_v44  }
 0x76f   :  { %v807_v16 = vpop.permute.xlu0 %806 }
 0x770   :  { %v815_v17 = vsub.f32 %v1355_v47, %v807_v16 }
 0x772   :  { %v819_v19 = vmul.f32 %v994_v18, %v815_v17 }
 0x774   :  { %v823_v21 = vmul.f32 -0.5, %v819_v19 }
 0x776   :  { %v827_v22 = vmul.f32 %v823_v21, %v819_v19 }
 0x778   :  { %v839_v24 = vsub.f32 %v827_v22, %v835_v23 }
 0x77a   :  { %v937_v25 = vadd.f32 -0.9189385, %v839_v24 }
 0x77c   :  { %869 = vperm.xlu1 %949, %v937_v25  }
 0x7ae   :  { %v860_v28 = vpop.permute.xlu2 %859 }
 0x7af   :  { %v873_v30 = vmul.f32 %v860_v28, %v849_v27 }
 0x7b1   :  { %v877_v47 = vsel %vm147_vm1, %v873_v30, 0.0 }
 0x7ce   :  { %v865_v33 = vpop.permute.xlu0 %864 }
 0x7cf   :  { %v874_v35 = vmul.f32 %v865_v33, %v850_v31 }
 0x7d1   :  { %v879_v40 = vsel %vm147_vm1, %v874_v35, 0.0 }
 0x7d6   :  { %v855_v38 = vpop.permute.xlu1 %854 }
 0x7d7   :  { %v872_v29 = vmul.f32 %v855_v38, %v848_v26 }
 0x7d9   :  { %v876_v34 = vsel %vm147_vm1, %v872_v29, 0.0 }
 0x7da   :  { %v878_v37 = vadd.f32 %v877_v47, %v876_v34 }
 0x7dc   :  { %v880_v42 = vadd.f32 %v879_v40, %v878_v37 }
 0x7ee   :  { %v870_v36 = vpop.permute.xlu1 %869 }
 0x7ef   :  { %v875_v41 = vmul.f32 %v870_v36, %v851_v39 }
 0x7f1   :  { %v881_v43 = vsel %vm147_vm1, %v875_v41, 0.0 }
 0x7f2   :  { %v882_v48 = vadd.f32 %v881_v43, %v880_v42 }
 0x7f4   :  { %v883_v49 = vrot.slane %v882_v48, 4 }
 0x7f6   :  { %v884_v50 = vadd.f32 %v883_v49, %v882_v48 }
 0x7f8   :  { %v885_v51 = vrot.slane %v884_v50, 2 }
 0x7fa   :  { %v886_v52 = vadd.f32 %v885_v51, %v884_v50 }
 0x7fc   :  { %v887_v53 = vrot.slane %v886_v52, 1 }
 0x7fe   :  { %v888_v54 = vadd.f32 %v887_v53, %v886_v52 }
 0x800   :  { %890 = vst.msk [vmem:[%s1459_s18] sm:$0x1] %vm889_vm4, %v888_v54 }
 0x801   :  { %895 = vsyncpa [#allocation3], 1 }
 0x802   :  { %896 = vsyncpa [#allocation5], 1 }
 0x803   :  { %897 = vsyncpa [#allocation8], 1 }

</bundles_post_ra>
